<compile_context>
chip_gen: v5e
topology: v5e:2x2
jax: 0.10.0
libtpu: 0.0.40
codegen_flags: <defaults>
</compile_context>

<pallas_src>
import jax
import jax.numpy as jnp
from jax.experimental import pallas as pl
from jax.experimental.pallas import tpu as pltpu


def _mlp_kernel(x_ref, w1_ref, b1_ref, w2_ref, b2_ref, w3_ref, b3_ref,
                gamma_ref, beta_ref, o_ref):
    wdt = w1_ref.dtype                       # matmul input dtype (f32 or bf16)
    x = x_ref[...].astype(wdt)

    # Linear(input_dim, hidden_dim) + ReLU      (f32 accumulation on the MXU)
    h = jnp.dot(x, w1_ref[...], preferred_element_type=jnp.float32) + b1_ref[...]
    h = jnp.maximum(h, 0.0)

    # Linear(hidden_dim, hidden_dim) + ReLU
    h = jnp.dot(h.astype(wdt), w2_ref[...],
                preferred_element_type=jnp.float32) + b2_ref[...]
    h = jnp.maximum(h, 0.0)

    # Linear(hidden_dim, output_dim)
    y = jnp.dot(h.astype(wdt), w3_ref[...],
                preferred_element_type=jnp.float32) + b3_ref[...]

    # LayerNorm(output_dim), eps = 1e-5 (PyTorch default), elementwise affine.
    # Statistics and the affine stay in f32.
    mean = jnp.mean(y, axis=-1, keepdims=True)
    var = jnp.mean(jnp.square(y - mean), axis=-1, keepdims=True)
    y_hat = (y - mean) * jax.lax.rsqrt(var + 1e-5)
    o_ref[...] = (y_hat * gamma_ref[...] + beta_ref[...]).astype(o_ref.dtype)


def _choose_tb(B, d_in, d_out, hidden, x_itemsize):
    """Largest legal batch tile under a conservative VMEM budget."""
    budget = 8 << 20                                   # bytes for pipelined tiles
    # x / out tiles are double-buffered; leave headroom for f32 activations.
    per_row = 2 * (d_in * x_itemsize + d_out * 4) + 2 * hidden * 4
    max_rows = min(2048, max(8, budget // max(per_row, 1)))
    if B <= max_rows:
        return B                                       # single grid step
    align = 8 * max(1, 4 // x_itemsize)                # 8 for f32, 16 for bf16
    tb = (max_rows // align) * align
    while tb >= align:
        if B % tb == 0:
            return tb
        tb -= align
    # No aligned divisor: fall back to a single full-dim block (always legal).
    return B


def embedding_mlp(x, params, *, tb=None, matmul_dtype=None):
    """Fused MLP + LayerNorm forward.  x: [B, input_dim] float32."""
    w1, b1, w2, b2, w3, b3, gamma, beta = params
    B, D_in = x.shape
    H = w1.shape[1]
    D_out = w3.shape[1]

    if matmul_dtype is not None:
        # bf16 (etc.) inputs to the dots; biases / LN params stay f32.
        x = x.astype(matmul_dtype)
        w1 = w1.astype(matmul_dtype)
        w2 = w2.astype(matmul_dtype)
        w3 = w3.astype(matmul_dtype)

    x_itemsize = jnp.dtype(x.dtype).itemsize
    if tb is None:
        tb = _choose_tb(B, D_in, D_out, H, x_itemsize)
    assert B % tb == 0, "batch must be divisible by the batch tile"

    # Weights & small params live untiled in VMEM for the whole kernel
    # (copied in once; no per-step re-DMA, no double buffering).
    resident = pl.BlockSpec(memory_space=pltpu.MemorySpace.VMEM)

    weight_bytes = sum(int(a.size) * jnp.dtype(a.dtype).itemsize
                       for a in (w1, b1, w2, b2, w3, b3, gamma, beta))
    tile_bytes = 2 * tb * (D_in * x_itemsize + D_out * 4) + 4 * tb * H * 4
    vmem_limit = int(min(32 << 20, max(16 << 20, 4 * (weight_bytes + tile_bytes))))

    return pl.pallas_call(
        _mlp_kernel,
        out_shape=jax.ShapeDtypeStruct((B, D_out), jnp.float32),
        grid=(B // tb,),
        in_specs=[
            pl.BlockSpec((tb, D_in), lambda i: (i, 0)),   # x tile (pipelined)
            resident,                                     # W1
            resident,                                     # b1
            resident,                                     # W2
            resident,                                     # b2
            resident,                                     # W3
            resident,                                     # b3
            resident,                                     # gamma
            resident,                                     # beta
        ],
        out_specs=pl.BlockSpec((tb, D_out), lambda i: (i, 0)),
        compiler_params=pltpu.CompilerParams(
            dimension_semantics=("parallel",),            # shards across v7x TCs
            vmem_limit_bytes=vmem_limit,
        ),
    )(x, w1, b1, w2, b2, w3, b3, gamma, beta)


def init_params(key, input_dim, hidden_dim, output_dim):
    """Deterministic synthetic parameters (same shapes as the nn.Module)."""
    ks = jax.random.split(key, 6)
    scale = 0.1
    w1 = scale * jax.random.normal(ks[0], (input_dim, hidden_dim), jnp.float32)
    b1 = scale * jax.random.normal(ks[1], (1, hidden_dim), jnp.float32)
    w2 = scale * jax.random.normal(ks[2], (hidden_dim, hidden_dim), jnp.float32)
    b2 = scale * jax.random.normal(ks[3], (1, hidden_dim), jnp.float32)
    w3 = scale * jax.random.normal(ks[4], (hidden_dim, output_dim), jnp.float32)
    b3 = scale * jax.random.normal(ks[5], (1, output_dim), jnp.float32)
    gamma = jnp.ones((1, output_dim), jnp.float32)   # LayerNorm weight init
    beta = jnp.zeros((1, output_dim), jnp.float32)   # LayerNorm bias init
    return (w1, b1, w2, b2, w3, b3, gamma, beta)


def reference(x, params, matmul_dtype=None):
    """Pure-JAX reference mirroring the kernel's dtype handling."""
    w1, b1, w2, b2, w3, b3, gamma, beta = params
    cast = (lambda a: a) if matmul_dtype is None else (lambda a: a.astype(matmul_dtype))
    dot = lambda a, b: jnp.dot(cast(a), cast(b), preferred_element_type=jnp.float32)
    h = jnp.maximum(dot(x, w1) + b1, 0.0)
    h = jnp.maximum(dot(h, w2) + b2, 0.0)
    y = dot(h, w3) + b3
    mean = jnp.mean(y, axis=-1, keepdims=True)
    var = jnp.mean((y - mean) ** 2, axis=-1, keepdims=True)
    return (y - mean) / jnp.sqrt(var + 1e-5) * gamma + beta


if __name__ == "__main__":
    key = jax.random.PRNGKey(0)
    B, input_dim, hidden_dim, output_dim = 16, 16, 32, 16

    kx, kp = jax.random.split(key)
    x = jax.random.normal(kx, (B, input_dim), jnp.float32)
    params = init_params(kp, input_dim, hidden_dim, output_dim)

    # f32 path (single grid step for this size), tight check vs reference.
    out = jax.block_until_ready(embedding_mlp(x, params))
    ref = reference(x, params)
    assert out.shape == (B, output_dim)
    assert jnp.allclose(out, ref, atol=1e-4, rtol=1e-4), "f32 mismatch vs reference"

    # bf16 matmul-input path (v6e/v7x bandwidth optimization); LN stays f32.
    out_bf16 = jax.block_until_ready(
        embedding_mlp(x, params, matmul_dtype=jnp.bfloat16))
    ref_bf16 = reference(x, params, matmul_dtype=jnp.bfloat16)
    assert out_bf16.shape == (B, output_dim)
    assert jnp.allclose(out_bf16, ref_bf16, atol=1e-2, rtol=1e-2), \
        "bf16 mismatch vs bf16 reference"

    print("KERNEL_OK")
</pallas_src>

<mosaic_0001>
module attributes {stable_mosaic.version = 11 : i64} {
  func.func @_mlp_kernel(%arg0: i32, %arg1: memref<16x16xf32, #tpu.memory_space<vmem>>, %arg2: memref<16x32xf32, #tpu.memory_space<vmem>>, %arg3: memref<1x32xf32, #tpu.memory_space<vmem>>, %arg4: memref<32x32xf32, #tpu.memory_space<vmem>>, %arg5: memref<1x32xf32, #tpu.memory_space<vmem>>, %arg6: memref<32x16xf32, #tpu.memory_space<vmem>>, %arg7: memref<1x16xf32, #tpu.memory_space<vmem>>, %arg8: memref<1x16xf32, #tpu.memory_space<vmem>>, %arg9: memref<1x16xf32, #tpu.memory_space<vmem>>, %arg10: memref<16x16xf32, #tpu.memory_space<vmem>>) attributes {dimension_semantics = [#tpu.dimension_semantics<parallel>], iteration_bounds = array<i64: 1>, scalar_prefetch = 0 : i64, scratch_operands = 0 : i64, tpu.core_type = #tpu.core_type<tc>, window_params = [{transform_indices = @transform_0, window_bounds = array<i64: 16, 16>}, {pipeline_mode = #tpu.pipeline_mode<synchronous>, transform_indices = @transform_1, window_bounds = array<i64: 16, 32>}, {pipeline_mode = #tpu.pipeline_mode<synchronous>, transform_indices = @transform_2, window_bounds = array<i64: 1, 32>}, {pipeline_mode = #tpu.pipeline_mode<synchronous>, transform_indices = @transform_3, window_bounds = array<i64: 32, 32>}, {pipeline_mode = #tpu.pipeline_mode<synchronous>, transform_indices = @transform_4, window_bounds = array<i64: 1, 32>}, {pipeline_mode = #tpu.pipeline_mode<synchronous>, transform_indices = @transform_5, window_bounds = array<i64: 32, 16>}, {pipeline_mode = #tpu.pipeline_mode<synchronous>, transform_indices = @transform_6, window_bounds = array<i64: 1, 16>}, {pipeline_mode = #tpu.pipeline_mode<synchronous>, transform_indices = @transform_7, window_bounds = array<i64: 1, 16>}, {pipeline_mode = #tpu.pipeline_mode<synchronous>, transform_indices = @transform_8, window_bounds = array<i64: 1, 16>}, {transform_indices = @transform_9, window_bounds = array<i64: 16, 16>}]} {
    %c0 = arith.constant 0 : index
    %c0_0 = arith.constant 0 : index
    %0 = vector.load %arg1[%c0, %c0_0] : memref<16x16xf32, #tpu.memory_space<vmem>>, vector<16x16xf32>
    %c0_1 = arith.constant 0 : index
    %c0_2 = arith.constant 0 : index
    %1 = vector.load %arg2[%c0_1, %c0_2] : memref<16x32xf32, #tpu.memory_space<vmem>>, vector<16x32xf32>
    %cst = arith.constant dense<0.000000e+00> : vector<16x32xf32>
    %2 = tpu.matmul %0, %1, %cst {dimension_numbers = #tpu.dot_dimension_numbers<[1], [0], [0], [1], [0, 0, 1, 1], [], []>} : vector<16x16xf32>, vector<16x32xf32>, vector<16x32xf32> -> vector<16x32xf32>
    %c0_3 = arith.constant 0 : index
    %c0_4 = arith.constant 0 : index
    %3 = vector.load %arg3[%c0_3, %c0_4] : memref<1x32xf32, #tpu.memory_space<vmem>>, vector<1x32xf32>
    %4 = vector.broadcast %3 : vector<1x32xf32> to vector<16x32xf32>
    %5 = arith.addf %2, %4 : vector<16x32xf32>
    %cst_5 = arith.constant 0.000000e+00 : f32
    %6 = vector.broadcast %cst_5 : f32 to vector<16x32xf32>
    %7 = arith.maximumf %5, %6 : vector<16x32xf32>
    %c0_6 = arith.constant 0 : index
    %c0_7 = arith.constant 0 : index
    %8 = vector.load %arg4[%c0_6, %c0_7] : memref<32x32xf32, #tpu.memory_space<vmem>>, vector<32x32xf32>
    %cst_8 = arith.constant dense<0.000000e+00> : vector<16x32xf32>
    %9 = tpu.matmul %7, %8, %cst_8 {dimension_numbers = #tpu.dot_dimension_numbers<[1], [0], [0], [1], [0, 0, 1, 1], [], []>} : vector<16x32xf32>, vector<32x32xf32>, vector<16x32xf32> -> vector<16x32xf32>
    %c0_9 = arith.constant 0 : index
    %c0_10 = arith.constant 0 : index
    %10 = vector.load %arg5[%c0_9, %c0_10] : memref<1x32xf32, #tpu.memory_space<vmem>>, vector<1x32xf32>
    %11 = vector.broadcast %10 : vector<1x32xf32> to vector<16x32xf32>
    %12 = arith.addf %9, %11 : vector<16x32xf32>
    %cst_11 = arith.constant 0.000000e+00 : f32
    %13 = vector.broadcast %cst_11 : f32 to vector<16x32xf32>
    %14 = arith.maximumf %12, %13 : vector<16x32xf32>
    %c0_12 = arith.constant 0 : index
    %c0_13 = arith.constant 0 : index
    %15 = vector.load %arg6[%c0_12, %c0_13] : memref<32x16xf32, #tpu.memory_space<vmem>>, vector<32x16xf32>
    %cst_14 = arith.constant dense<0.000000e+00> : vector<16x16xf32>
    %16 = tpu.matmul %14, %15, %cst_14 {dimension_numbers = #tpu.dot_dimension_numbers<[1], [0], [0], [1], [0, 0, 1, 1], [], []>} : vector<16x32xf32>, vector<32x16xf32>, vector<16x16xf32> -> vector<16x16xf32>
    %c0_15 = arith.constant 0 : index
    %c0_16 = arith.constant 0 : index
    %17 = vector.load %arg7[%c0_15, %c0_16] : memref<1x16xf32, #tpu.memory_space<vmem>>, vector<1x16xf32>
    %18 = vector.broadcast %17 : vector<1x16xf32> to vector<16x16xf32>
    %19 = arith.addf %16, %18 : vector<16x16xf32>
    %cst_17 = arith.constant dense<0.000000e+00> : vector<16xf32>
    %20 = vector.multi_reduction <add>, %19, %cst_17 [1] : vector<16x16xf32> to vector<16xf32>
    %21 = vector.shape_cast %20 : vector<16xf32> to vector<16x1xf32>
    %cst_18 = arith.constant 1.600000e+01 : f32
    %22 = vector.broadcast %cst_18 : f32 to vector<16x1xf32>
    %23 = arith.divf %21, %22 : vector<16x1xf32>
    %24 = vector.broadcast %23 : vector<16x1xf32> to vector<16x16xf32>
    %25 = arith.subf %19, %24 : vector<16x16xf32>
    %26 = arith.mulf %25, %25 : vector<16x16xf32>
    %cst_19 = arith.constant dense<0.000000e+00> : vector<16xf32>
    %27 = vector.multi_reduction <add>, %26, %cst_19 [1] : vector<16x16xf32> to vector<16xf32>
    %28 = vector.shape_cast %27 : vector<16xf32> to vector<16x1xf32>
    %cst_20 = arith.constant 1.600000e+01 : f32
    %29 = vector.broadcast %cst_20 : f32 to vector<16x1xf32>
    %30 = arith.divf %28, %29 : vector<16x1xf32>
    %31 = vector.broadcast %23 : vector<16x1xf32> to vector<16x16xf32>
    %32 = arith.subf %19, %31 : vector<16x16xf32>
    %cst_21 = arith.constant 9.99999974E-6 : f32
    %33 = vector.broadcast %cst_21 : f32 to vector<16x1xf32>
    %34 = arith.addf %30, %33 : vector<16x1xf32>
    %35 = math.rsqrt %34 : vector<16x1xf32>
    %36 = vector.broadcast %35 : vector<16x1xf32> to vector<16x16xf32>
    %37 = arith.mulf %32, %36 : vector<16x16xf32>
    %c0_22 = arith.constant 0 : index
    %c0_23 = arith.constant 0 : index
    %38 = vector.load %arg8[%c0_22, %c0_23] : memref<1x16xf32, #tpu.memory_space<vmem>>, vector<1x16xf32>
    %39 = vector.broadcast %38 : vector<1x16xf32> to vector<16x16xf32>
    %40 = arith.mulf %37, %39 : vector<16x16xf32>
    %c0_24 = arith.constant 0 : index
    %c0_25 = arith.constant 0 : index
    %41 = vector.load %arg9[%c0_24, %c0_25] : memref<1x16xf32, #tpu.memory_space<vmem>>, vector<1x16xf32>
    %42 = vector.broadcast %41 : vector<1x16xf32> to vector<16x16xf32>
    %43 = arith.addf %40, %42 : vector<16x16xf32>
    %c0_26 = arith.constant 0 : index
    %c0_27 = arith.constant 0 : index
    %44 = vector.load %arg10[%c0_26, %c0_27] : memref<16x16xf32, #tpu.memory_space<vmem>>, vector<16x16xf32>
    tpu.vector_store %arg10[%c0_26, %c0_27], %43 {strides = array<i32>} : memref<16x16xf32, #tpu.memory_space<vmem>>, vector<16x16xf32>,
    return
  }
  func.func @transform_0(%arg0: i32) -> (i32, i32) {
    %c0_i32 = arith.constant 0 : i32
    %c0_i32_0 = arith.constant 0 : i32
    return %arg0, %c0_i32 : i32, i32
  }
  func.func @transform_1(%arg0: i32) -> (i32, i32) {
    %c0_i32 = arith.constant 0 : i32
    %c0_i32_0 = arith.constant 0 : i32
    %c0_i32_1 = arith.constant 0 : i32
    return %c0_i32, %c0_i32_0 : i32, i32
  }
  func.func @transform_2(%arg0: i32) -> (i32, i32) {
    %c0_i32 = arith.constant 0 : i32
    %c0_i32_0 = arith.constant 0 : i32
    %c0_i32_1 = arith.constant 0 : i32
    return %c0_i32, %c0_i32_0 : i32, i32
  }
  func.func @transform_3(%arg0: i32) -> (i32, i32) {
    %c0_i32 = arith.constant 0 : i32
    %c0_i32_0 = arith.constant 0 : i32
    %c0_i32_1 = arith.constant 0 : i32
    return %c0_i32, %c0_i32_0 : i32, i32
  }
  func.func @transform_4(%arg0: i32) -> (i32, i32) {
    %c0_i32 = arith.constant 0 : i32
    %c0_i32_0 = arith.constant 0 : i32
    %c0_i32_1 = arith.constant 0 : i32
    return %c0_i32, %c0_i32_0 : i32, i32
  }
  func.func @transform_5(%arg0: i32) -> (i32, i32) {
    %c0_i32 = arith.constant 0 : i32
    %c0_i32_0 = arith.constant 0 : i32
    %c0_i32_1 = arith.constant 0 : i32
    return %c0_i32, %c0_i32_0 : i32, i32
  }
  func.func @transform_6(%arg0: i32) -> (i32, i32) {
    %c0_i32 = arith.constant 0 : i32
    %c0_i32_0 = arith.constant 0 : i32
    %c0_i32_1 = arith.constant 0 : i32
    return %c0_i32, %c0_i32_0 : i32, i32
  }
  func.func @transform_7(%arg0: i32) -> (i32, i32) {
    %c0_i32 = arith.constant 0 : i32
    %c0_i32_0 = arith.constant 0 : i32
    %c0_i32_1 = arith.constant 0 : i32
    return %c0_i32, %c0_i32_0 : i32, i32
  }
  func.func @transform_8(%arg0: i32) -> (i32, i32) {
    %c0_i32 = arith.constant 0 : i32
    %c0_i32_0 = arith.constant 0 : i32
    %c0_i32_1 = arith.constant 0 : i32
    return %c0_i32, %c0_i32_0 : i32, i32
  }
  func.func @transform_9(%arg0: i32) -> (i32, i32) {
    %c0_i32 = arith.constant 0 : i32
    %c0_i32_0 = arith.constant 0 : i32
    return %arg0, %c0_i32 : i32, i32
  }
}

</mosaic_0001>

<bundles_post_ra>
// kernel: tpu_custom_call.1
= control target key start
LH: loop header
LB: loop body
LE: loop exit
PB: predicated region body
PF: predicated region fallthrough
CT: control target
= control target key end

     0   :  { %14 = vsyncpa [#allocation3], 0  ;;  %s452_s0 = inlined_call_operand.vmem [shape: f32[16,16], index: 0, kind: input, shape index: {}]   ;;  %s453_s1 = inlined_call_operand.hbm [shape: f32[16,32], index: 1, kind: input, shape index: {}]   ;;  %s454_s2 = inlined_call_operand.vmem [shape: f32[1,32], index: 2, kind: input, shape index: {}]   ;;  %s455_s3 = inlined_call_operand.vmem [shape: f32[32,32], index: 3, kind: input, shape index: {}]   ;;  %s456_s4 = inlined_call_operand.vmem [shape: f32[1,32], index: 4, kind: input, shape index: {}]   ;;  %s457_s5 = inlined_call_operand.vmem [shape: f32[32,16], index: 5, kind: input, shape index: {}]   ;;  %s458_s6 = inlined_call_operand.vmem [shape: f32[1,16], index: 6, kind: input, shape index: {}]   ;;  %s459_s7 = inlined_call_operand.vmem [shape: f32[1,16], index: 7, kind: input, shape index: {}]   ;;  %s460_s8 = inlined_call_operand.vmem [shape: f32[1,16], index: 8, kind: input, shape index: {}]   ;;  %s461_s9 = inlined_call_operand.hbm [shape: f32[16,16], index: 9, kind: output, shape index: {}]  }
   0x1   :  { %15 = vsyncpa [#allocation4], 0  ;;  %s22_s11 = sshll.u32 %s453_s1, 4  ;;  %s328_s12 = smov [#allocation2]   ;;  %s23_s11 = int_to_ptr.hbm [resolvable:$true] %s22_s11 }
   0x2   :  { %s24_s13 = sshll.u32 %s328_s12, 4  ;;  %s329_s14 = smov 128   ;;  %s25_s13 = int_to_ptr.vmem [resolvable:$true] %s24_s13 }
   0x3   :  { %s330_s15 = smov 8  }
   0x4   :  { %30 = dma.hbm_to_vmem [thread:$0]  %s23_s11, 256, %s25_s13, [#allocation3], %s329_s14, %s329_s14, %s330_s15  }
   0x5   :  { %324 = dma.done.wait [#allocation3], 256  }
   0x6   :  { %325 = vsyncadd [#allocation3], 4294967040  ;;  %v52_v0 = vld [vmem:[#allocation2 + $0x8] sm:$0xff]  ;;  %v51_v1 = vld [vmem:[#allocation2] sm:$0xff]  ;;  %vm57_vm0 = vcmask 130048   ;;  %vm97_vm1 = vcmask 261120  }
   0x7   :  { %78 = vmatpush.msra.mxu0 %v52_v0  ;;  %v49_v2 = vld [vmem:[%s452_s0] sm:$0xff]  ;;  %v92_v3 = vld [vmem:[%s455_s3 + $0x18] sm:$0xff]  ;;  %v50_v4 = vld [vmem:[%s452_s0 + $0x8] sm:$0xff]  ;;  %v331_v33 = vmov 16.0  }
   0x8   :  { %116 = vmatpush.msra.mxu1 %v92_v3  ;;  %256 = vmatpush.msra.mxu3 %v92_v3  ;;  %v91_v5 = vld [vmem:[%s455_s3 + $0x10] sm:$0xff]  ;;  %v90_v6 = vld [vmem:[%s455_s3 + $0x8] sm:$0xff]  ;;  %v89_v7 = vld [vmem:[%s455_s3] sm:$0xff]  ;;  %270 = vrcp.f32 %v331_v33 }
   0x9   :  { %79 = vmatpush.msra.mxu0 %v51_v1  ;;  %v132_v8 = vld [vmem:[%s457_s5 + $0x18] sm:$0xff]  ;;  %v265_v9 = vld [vmem:[%s454_s2] ss:$0 sm:$0xff]  ;;  %v131_v16 = vld [vmem:[%s457_s5 + $0x10] sm:$0xff] }
   0xa   :  { %250 = vmatmul.msk.f32.vlgmr.msra.gmra.mxu0 %vm57_vm0, %v49_v2  ;;  %117 = vmatpush.msra.mxu1 %v91_v5  ;;  %v130_v17 = vld [vmem:[%s457_s5 + $0x8] sm:$0xff]  ;;  %v129_v18 = vld [vmem:[%s457_s5] sm:$0xff] }
   0xb   :  { %257 = vmatpush.msra.mxu3 %v91_v5  ;;  %155 = vmatpush.msra.mxu2 %v132_v8  ;;  %v266_v19 = vld [vmem:[%s456_s4] ss:$0 sm:$0xff] }
   0xc   :  { %118 = vmatpush.msra.mxu1 %v90_v6  ;;  %v267_v26 = vld [vmem:[%s458_s6] ss:$0 sm:$0xff] }
   0xd   :  { %258 = vmatpush.msra.mxu3 %v90_v6  ;;  %156 = vmatpush.msra.mxu2 %v131_v16  ;;  %v268_v62 = vld [vmem:[%s459_s7] ss:$0 sm:$0xff]  ;;  %s332_s7 = smov [#allocation5]  }
   0xe   :  { %119 = vmatpush.msra.mxu1 %v89_v7  ;;  %v271_v34 = vpop.eup %270  ;;  %v269_v1 = vld [vmem:[%s460_s8] ss:$0 sm:$0xff]  ;;  %s235_s19 = sshll.u32 %s332_s7, 4  ;;  %s237_s8 = sshll.u32 %s461_s9, 4  ;;  %s236_s19 = int_to_ptr.vmem [resolvable:$true] %s235_s19  ;;  %s238_s8 = int_to_ptr.hbm [resolvable:$true] %s237_s8 }
   0xf   :  { %259 = vmatpush.msra.mxu3 %v89_v7  ;;  %157 = vmatpush.msra.mxu2 %v130_v17  ;;  %v173_v35 = vmul.f32 16.0, %v271_v34  ;;  %vm177_vm2 = vweird.f32 %v271_v34 }
  0x11   :  { %158 = vmatpush.msra.mxu2 %v129_v18  ;;  %v174_v36 = vsub.f32 1.0, %v173_v35 }
  0x12   :  { %251 = vmatmul.msk.f32.gmra.mxu0 %vm57_vm0, %v50_v4 }
  0x13   :  { %v175_v37 = vmul.f32 %v271_v34, %v174_v36 }
  0x15   :  { %v176_v38 = vadd.f32 %v271_v34, %v175_v37 }
  0x17   :  { %v178_v39 = vsel %vm177_vm2, %v271_v34, %v176_v38 }
  0x87   :  { %v81_v10 = vpop.f32.mrf.mxu0 }
  0x88   :  { %v82_v11 = vadd.f32 %v265_v9, %v81_v10 }
  0x8a   :  { %v87_v12 = vmax.f32 %v82_v11, 0.0 }
  0x8c   :  { %252 = vmatmul.msk.f32.vlgmr.msra.gmra.mxu1 %vm97_vm1, %v87_v12 }
  0x8f   :  { %v84_v13 = vpop.f32.mrf.mxu0 }
  0x90   :  { %v85_v14 = vadd.f32 %v265_v9, %v84_v13 }
  0x92   :  { %v88_v15 = vmax.f32 %v85_v14, 0.0 }
  0x94   :  { %253 = vmatmul.msk.f32.vlgmr.msra.gmra.mxu3 %vm97_vm1, %v88_v15 }
 0x109   :  { %v121_v20 = vpop.f32.mrf.mxu1 }
 0x10a   :  { %v122_v21 = vadd.f32 %v266_v19, %v121_v20 }
 0x10c   :  { %v127_v22 = vmax.f32 %v122_v21, 0.0 }
 0x10e   :  { %254 = vmatmul.msk.f32.vlgmr.msra.gmra.mxu2 %vm97_vm1, %v127_v22 }
 0x117   :  { %v124_v23 = vpop.f32.mrf.mxu3 }
 0x118   :  { %v125_v24 = vadd.f32 %v266_v19, %v124_v23 }
 0x11a   :  { %v128_v25 = vmax.f32 %v125_v24, 0.0 }
 0x11c   :  { %255 = vmatmul.msk.f32.gmra.mxu2 %vm97_vm1, %v128_v25 }
 0x191   :  { %v160_v27 = vpop.f32.mrf.mxu2 }
 0x192   :  { %v161_v28 = vadd.f32 %v267_v26, %v160_v27 }
 0x194   :  { %v166_v29 = vsel %vm57_vm0, %v161_v28, 0.0 }
 0x195   :  { %167 = vadd.xlane.f32.xlu0 %v166_v29 }
 0x19f   :  { %v163_v30 = vpop.f32.mrf.mxu2 }
 0x1a0   :  { %v164_v31 = vadd.f32 %v267_v26, %v163_v30 }
 0x1a2   :  { %v169_v32 = vsel %vm57_vm0, %v164_v31, 0.0 }
 0x1a3   :  { %170 = vadd.xlane.f32.xlu0 %v169_v32 }
 0x208   :  { %v168_v40 = vpop.xlane.xlu0 %167 }
 0x209   :  { %v179_v41 = vmul.f32 %v178_v39, %v168_v40 }
 0x20b   :  { %v181_v42 = vsub.f32 %v161_v28, %v179_v41 }
 0x20d   :  { %v183_v43 = vmul.f32 %v181_v42, %v181_v42 }
 0x20f   :  { %v185_v44 = vsel %vm57_vm0, %v183_v43, 0.0 }
 0x210   :  { %186 = vadd.xlane.f32.xlu1 %v185_v44 }
 0x216   :  { %v171_v45 = vpop.xlane.xlu0 %170 }
 0x217   :  { %v180_v46 = vmul.f32 %v178_v39, %v171_v45 }
 0x219   :  { %v182_v47 = vsub.f32 %v164_v31, %v180_v46 }
 0x21b   :  { %v184_v48 = vmul.f32 %v182_v47, %v182_v47 }
 0x21d   :  { %v188_v49 = vsel %vm57_vm0, %v184_v48, 0.0 }
 0x21e   :  { %189 = vadd.xlane.f32.xlu1 %v188_v49 }
 0x283   :  { %v187_v50 = vpop.xlane.xlu1 %186 }
 0x284   :  { %v191_v51 = vmul.f32 %v187_v50, %v178_v39 }
 0x286   :  { %v193_v52 = vadd.f32 1e-05, %v191_v51 }
 0x288   :  { %272 = vrsqrt.f32 %v193_v52  ;;  %vm201_vm4 = vweird.f32 %v193_v52 }
 0x28e   :  { %v273_v53 = vpop.eup %272 }
 0x28f   :  { %v196_v54 = vmul.f32 %v273_v53, %v193_v52  ;;  %vm202_vm3 = vweird.f32 %v273_v53 }
 0x290   :  { %vm203_vm5 = vmor %vm201_vm4, %vm202_vm3 }
 0x291   :  { %v197_v55 = vmul.f32 %v273_v53, %v196_v54  ;;  %v190_v56 = vpop.xlane.xlu1 %189 }
 0x292   :  { %v192_v57 = vmul.f32 %v190_v56, %v178_v39 }
 0x293   :  { %v198_v58 = vmul.f32 0.5, %v197_v55 }
 0x294   :  { %v194_v59 = vadd.f32 1e-05, %v192_v57 }
 0x295   :  { %v199_v60 = vsub.f32 1.5, %v198_v58 }
 0x296   :  { %274 = vrsqrt.f32 %v194_v59  ;;  %vm211_vm7 = vweird.f32 %v194_v59 }
 0x297   :  { %v200_v61 = vmul.f32 %v273_v53, %v199_v60 }
 0x299   :  { %v204_v63 = vsel %vm203_vm5, %v273_v53, %v200_v61 }
 0x29a   :  { %v215_v0 = vmul.f32 %v204_v63, %v181_v42 }
 0x29c   :  { %v275_v2 = vpop.eup %274  ;;  %v221_v3 = vmul.f32 %v268_v62, %v215_v0 }
 0x29d   :  { %v206_v4 = vmul.f32 %v275_v2, %v194_v59  ;;  %vm212_vm6 = vweird.f32 %v275_v2 }
 0x29e   :  { %v227_v5 = vadd.f32 %v269_v1, %v221_v3  ;;  %vm213_vm8 = vmor %vm211_vm7, %vm212_vm6 }
 0x29f   :  { %v207_v6 = vmul.f32 %v275_v2, %v206_v4 }
 0x2a0   :  { %229 = vst.msk [vmem:[#allocation5] sm:$0xff] %vm57_vm0, %v227_v5 }
 0x2a1   :  { %v208_v7 = vmul.f32 0.5, %v207_v6 }
 0x2a3   :  { %v209_v8 = vsub.f32 1.5, %v208_v7 }
 0x2a5   :  { %v210_v9 = vmul.f32 %v275_v2, %v209_v8 }
 0x2a7   :  { %v214_v10 = vsel %vm213_vm8, %v275_v2, %v210_v9 }
 0x2a8   :  { %v216_v11 = vmul.f32 %v214_v10, %v182_v47 }
 0x2aa   :  { %v222_v12 = vmul.f32 %v268_v62, %v216_v11 }
 0x2ac   :  { %v228_v13 = vadd.f32 %v269_v1, %v222_v12 }
 0x2ae   :  { %230 = vst.msk [vmem:[#allocation5 + $0x8] sm:$0xff] %vm57_vm0, %v228_v13 }
 0x2af   :  { %243 = dma.vmem_to_hbm [thread:$0]  %s236_s19, 256, %s238_s8, [#allocation4], %s329_s14, %s329_s14, %s330_s15  }
 0x2b0   :  { %326 = dma.done.wait [#allocation4], 256  }
 0x2b1   :  { %327 = vsyncadd [#allocation4], 4294967040 }
 0x2b2   :  { %248 = vsyncpa [#allocation3], 1 }
 0x2b3   :  { %249 = vsyncpa [#allocation4], 1 }

</bundles_post_ra>
